<compile_context>
chip_gen: v7x
topology: tpu7x:2x2x1
jax: 0.10.0
libtpu: 0.0.40
codegen_flags: <defaults>
</compile_context>

<pallas_src>
import functools

import jax
import jax.numpy as jnp
from jax.experimental import pallas as pl
from jax.experimental.pallas import tpu as pltpu

_LANE = 128      # vreg lane width  (last dim)
_SUBLANE = 8     # vreg sublane width (second-to-last dim)


def _round_up(x: int, m: int) -> int:
    return (x + m - 1) // m * m


def _pad2d(a, rows: int, cols: int):
    r, c = a.shape
    if r == rows and c == cols:
        return a
    return jnp.pad(a, ((0, rows - r), (0, cols - c)))


def _vmem_budget_bytes() -> int:
    """~80% of per-core VMEM (leave headroom for Mosaic scratch, esp. v7x 64 MiB/TC)."""
    try:
        cap = int(pltpu.get_tpu_info().vmem_capacity_bytes)
    except Exception:          # interpret mode / query unavailable -> be conservative
        cap = 64 << 20
    return int(cap * 0.8)


def _pick_tile_b(b_pad: int, per_row_bytes: int, resident_bytes: int,
                 budget: int) -> int:
    """Largest sublane-aligned batch tile that divides b_pad and fits the VMEM budget.

    Bigger tiles amortize the ~0.35 us/grid-step overhead and keep HBM DMAs large;
    the cap is lower when the budget looks like v7x (64 MiB shared with resident
    weights) than on v5e/v6e (128 MiB)."""
    cap = 512 if budget >= (96 << 20) else 256
    tile = min(_round_up(b_pad, _SUBLANE), cap)
    headroom = 2 << 20
    while tile > _SUBLANE and (
            b_pad % tile != 0
            or resident_bytes + tile * per_row_bytes + headroom > budget):
        tile -= _SUBLANE
    return max(tile, _SUBLANE)


# --------------------------------------------------------------------------- #
# Kernels
# --------------------------------------------------------------------------- #
def _lif_mc_step_kernel(
    x_ref, z_ref, v_ref, i_ref, w_cat_ref, g_t_ref,
    z_out_ref, v_out_ref, i_out_ref,
    *, n_in_rows, dt, tau_syn_inv, tau_mem_inv, v_leak, v_th, v_reset, mxu_dtype,
):
    v = v_ref[...]
    cur = i_ref[...]

    # Multi-compartment coupling (MXU): v_c = v + dt * (v @ g_coupling^T)
    v_c = v + dt * jnp.dot(v.astype(mxu_dtype), g_t_ref[...],
                           preferred_element_type=jnp.float32)

    # Euler integration (f32 on the VPU).
    v_decayed = v_c + (dt * tau_mem_inv) * (v_leak - v_c + cur)
    i_decayed = cur - (dt * tau_syn_inv) * cur

    # heaviside(v_decayed - v_th): compare + select, then reset.
    spike = v_decayed > v_th
    v_new = jnp.where(spike, jnp.float32(v_reset), v_decayed)

    # i_new = i_decayed + x @ W_in^T + z @ W_rec^T
    # Two accumulating dots on static (zero-cost) views of the fused weight slab,
    # instead of materializing a per-step [x | z] concat.
    i_new = (i_decayed
             + jnp.dot(x_ref[...].astype(mxu_dtype), w_cat_ref[:n_in_rows, :],
                       preferred_element_type=jnp.float32)
             + jnp.dot(z_ref[...].astype(mxu_dtype), w_cat_ref[n_in_rows:, :],
                       preferred_element_type=jnp.float32))

    z_out_ref[...] = spike.astype(z_out_ref.dtype)   # bf16 {0,1}: lossless
    v_out_ref[...] = v_new
    i_out_ref[...] = i_new


def _lif_mc_seq_kernel(
    x_ref, z0_ref, v0_ref, i0_ref, w_cat_ref, g_t_ref,
    zs_ref, zf_ref, vf_ref, if_ref,
    z_s, v_s, i_s,
    *, n_in_rows, dt, tau_syn_inv, tau_mem_inv, v_leak, v_th, v_reset, mxu_dtype,
):
    """Whole sequence in one kernel: grid = (batch tiles, T); state lives in VMEM
    scratch across the T ("arbitrary") axis, weights are never re-fetched."""
    t = pl.program_id(1)

    @pl.when(t == 0)
    def _():
        z_s[...] = z0_ref[...].astype(jnp.float32)
        v_s[...] = v0_ref[...]
        i_s[...] = i0_ref[...]

    z = z_s[...]
    v = v_s[...]
    cur = i_s[...]

    v_c = v + dt * jnp.dot(v.astype(mxu_dtype), g_t_ref[...],
                           preferred_element_type=jnp.float32)
    v_decayed = v_c + (dt * tau_mem_inv) * (v_leak - v_c + cur)
    i_decayed = cur - (dt * tau_syn_inv) * cur

    spike = v_decayed > v_th
    v_new = jnp.where(spike, jnp.float32(v_reset), v_decayed)
    i_new = (i_decayed
             + jnp.dot(x_ref[0].astype(mxu_dtype), w_cat_ref[:n_in_rows, :],
                       preferred_element_type=jnp.float32)
             + jnp.dot(z.astype(mxu_dtype), w_cat_ref[n_in_rows:, :],
                       preferred_element_type=jnp.float32))

    zs_ref[0] = spike.astype(zs_ref.dtype)           # per-timestep spike output
    z_s[...] = spike.astype(jnp.float32)
    v_s[...] = v_new
    i_s[...] = i_new

    @pl.when(t == pl.num_programs(1) - 1)
    def _():                                          # final state, written once
        zf_ref[...] = spike.astype(zf_ref.dtype)
        vf_ref[...] = v_new
        if_ref[...] = i_new


# --------------------------------------------------------------------------- #
# One-time weight preparation (hoisted out of the per-timestep path)
# --------------------------------------------------------------------------- #
def prepare_lif_mc_weights(input_weights, recurrent_weights, g_coupling,
                           dtype=jnp.bfloat16):
    """input_weights [H, I], recurrent_weights [H, H], g_coupling [H, H] (PyTorch
    convention). Returns (w_cat [(Ip+Hp), Hp], g_t [Hp, Hp]) padded to lane
    multiples. Default dtype is bf16 on every TPU generation (halves resident
    weight VMEM and weight DMA; v5e's MXU is bf16-native). Pass dtype=jnp.float32
    if bit-tight agreement with an f32 reference is required — bf16 operands can
    flip spikes whose membrane potential sits within ~1e-2 of v_th."""
    H, I = input_weights.shape
    Ip = _round_up(I, _LANE)
    Hp = _round_up(H, _LANE)
    wi_t = _pad2d(jnp.asarray(input_weights, jnp.float32).T, Ip, Hp)       # [Ip, Hp]
    wr_t = _pad2d(jnp.asarray(recurrent_weights, jnp.float32).T, Hp, Hp)   # [Hp, Hp]
    w_cat = jnp.concatenate([wi_t, wr_t], axis=0).astype(dtype)
    g_t = _pad2d(jnp.asarray(g_coupling, jnp.float32).T, Hp, Hp).astype(dtype)
    return w_cat, g_t


# --------------------------------------------------------------------------- #
# Pad-once / slice-once API around the step kernel
# --------------------------------------------------------------------------- #
def pad_lif_mc_input(x, w_cat, g_t):
    """[B, I] -> padded [Bp, Ip] f32 slab (do this once per timestep's input)."""
    Hp = g_t.shape[0]
    Ip = w_cat.shape[0] - Hp
    B = x.shape[0]
    return _pad2d(x.astype(jnp.float32), _round_up(B, _SUBLANE), Ip)


def pad_lif_mc_state(z, v, i, g_t):
    """(z, v, i) [B, H] -> padded (bf16, f32, f32) [Bp, Hp] slabs. Do this ONCE and
    carry the padded state across timesteps."""
    Hp = g_t.shape[0]
    B = z.shape[0]
    Bp = _round_up(B, _SUBLANE)
    return (_pad2d(z.astype(jnp.bfloat16), Bp, Hp),
            _pad2d(v.astype(jnp.float32), Bp, Hp),
            _pad2d(i.astype(jnp.float32), Bp, Hp))


def unpad_lif_mc_state(z_p, v_p, i_p, batch, hidden):
    """Slice padding away ONCE at the end of the time loop. Padded hidden lanes may
    spike spuriously when v_leak > 0; they never contaminate real lanes (their
    weight rows are zero) but must be sliced off here."""
    return (z_p[:batch, :hidden].astype(jnp.float32),
            v_p[:batch, :hidden],
            i_p[:batch, :hidden])


def lif_mc_cell_step_padded(
    x_p, z_p, v_p, i_p, w_cat, g_t,
    *, dt=0.001, tau_syn_inv=1.0 / 0.005, tau_mem_inv=1.0 / 0.01,
    v_leak=0.0, v_th=1.0, v_reset=0.0,
):
    """One LIF-MC Euler step on PADDED slabs (the hot-loop entry point).
    Returns (z_p_new [bf16], v_p_new [f32], i_p_new [f32]) in the same padded
    layout, so it can be scanned without any pad/slice HBM traffic."""
    Hp = g_t.shape[0]
    Ip = w_cat.shape[0] - Hp
    Bp = z_p.shape[0]
    assert x_p.shape == (Bp, Ip), "x_p must come from pad_lif_mc_input"
    assert z_p.shape == v_p.shape == i_p.shape == (Bp, Hp), "state must be padded"
    assert z_p.dtype == jnp.bfloat16 and v_p.dtype == jnp.float32 \
        and i_p.dtype == jnp.float32, "state must come from pad_lif_mc_state"
    assert Bp % _SUBLANE == 0

    mxu_dtype = jnp.dtype(w_cat.dtype)
    weight_bytes = (w_cat.size + g_t.size) * mxu_dtype.itemsize   # Buffered(1): x1
    x_bytes = jnp.dtype(x_p.dtype).itemsize
    # Double-buffered activation rows (in + out): x + z(bf16) + v + i + z_out + v_out + i_out.
    per_row = 2 * (Ip * x_bytes + 20 * Hp)
    budget = _vmem_budget_bytes()
    tile_b = _pick_tile_b(Bp, per_row, weight_bytes, budget)
    grid = (Bp // tile_b,)

    vmem_need = weight_bytes + tile_b * per_row + (2 << 20)
    vmem_limit = int(min(max(vmem_need, 32 << 20), budget))

    kernel = functools.partial(
        _lif_mc_step_kernel, n_in_rows=Ip,
        dt=float(dt), tau_syn_inv=float(tau_syn_inv),
        tau_mem_inv=float(tau_mem_inv), v_leak=float(v_leak),
        v_th=float(v_th), v_reset=float(v_reset), mxu_dtype=mxu_dtype)

    cost = pl.CostEstimate(
        flops=2 * Bp * Hp * (Ip + 2 * Hp), transcendentals=0,
        bytes_accessed=weight_bytes + Bp * (Ip * x_bytes + 20 * Hp))

    x_spec = pl.BlockSpec((tile_b, Ip), lambda b: (b, 0))
    act_spec = pl.BlockSpec((tile_b, Hp), lambda b: (b, 0))
    # Constant-index weights: single-buffered so resident VMEM is weight_bytes x1.
    w_spec = pl.BlockSpec((Ip + Hp, Hp), lambda b: (0, 0),
                          pipeline_mode=pl.Buffered(1))
    g_spec = pl.BlockSpec((Hp, Hp), lambda b: (0, 0),
                          pipeline_mode=pl.Buffered(1))

    return pl.pallas_call(
        kernel,
        grid=grid,
        out_shape=(
            jax.ShapeDtypeStruct((Bp, Hp), jnp.bfloat16),   # z_new ({0,1}: lossless)
            jax.ShapeDtypeStruct((Bp, Hp), jnp.float32),    # v_new
            jax.ShapeDtypeStruct((Bp, Hp), jnp.float32),    # i_new
        ),
        in_specs=[x_spec, act_spec, act_spec, act_spec, w_spec, g_spec],
        out_specs=(act_spec, act_spec, act_spec),
        input_output_aliases={1: 0, 2: 1, 3: 2},            # update state in place
        compiler_params=pltpu.CompilerParams(
            dimension_semantics=("parallel",),
            vmem_limit_bytes=vmem_limit),
        cost_estimate=cost,
    )(x_p, z_p, v_p, i_p, w_cat, g_t)


# --------------------------------------------------------------------------- #
# Module-level single-step forward (matches LIFMCCell.forward)
# --------------------------------------------------------------------------- #
def lif_mc_cell_forward(x, z, v, i, w_cat, g_t, **params):
    """x: [B, I]; z, v, i: [B, H]; weights from prepare_lif_mc_weights.
    Convenience wrapper: pads, runs one step, slices. For a time loop, pad once,
    scan lif_mc_cell_step_padded, slice once — or use lif_mc_cell_forward_sequence."""
    B, H = z.shape
    Hp = g_t.shape[0]
    Ip = w_cat.shape[0] - Hp
    assert Ip >= x.shape[1] and Hp >= H, "prepared weights do not match activations"
    x_p = pad_lif_mc_input(x, w_cat, g_t)
    z_p, v_p, i_p = pad_lif_mc_state(z, v, i, g_t)
    z_p, v_p, i_p = lif_mc_cell_step_padded(x_p, z_p, v_p, i_p, w_cat, g_t, **params)
    z_new, v_new, i_new = unpad_lif_mc_state(z_p, v_p, i_p, B, H)
    return z_new, (z_new, v_new, i_new)


# --------------------------------------------------------------------------- #
# Sequence-level forward: T fused Euler steps in one pallas_call
# --------------------------------------------------------------------------- #
def lif_mc_cell_forward_sequence(
    xs, z0, v0, i0, w_cat, g_t,
    *, dt=0.001, tau_syn_inv=1.0 / 0.005, tau_mem_inv=1.0 / 0.01,
    v_leak=0.0, v_th=1.0, v_reset=0.0,
):
    """xs: [T, B, I]; z0/v0/i0: [B, H]. Returns (z_seq [T,B,H], (z_T, v_T, i_T)).
    Weights are DMA'd once per batch tile and the (z, v, i) state never leaves VMEM."""
    T, B, I = xs.shape
    H = z0.shape[-1]
    Hp = g_t.shape[0]
    Ip = w_cat.shape[0] - Hp
    assert Ip >= I and Hp >= H, "prepared weights do not match activations"
    Bp = _round_up(B, _SUBLANE)

    mxu_dtype = jnp.dtype(w_cat.dtype)
    weight_bytes = (w_cat.size + g_t.size) * mxu_dtype.itemsize   # Buffered(1): x1
    # x + z_seq blocks (double-buffered), state in/out blocks (x2), f32 state scratch.
    per_row = 8 * Ip + 56 * Hp
    budget = _vmem_budget_bytes()
    tile_b = _pick_tile_b(Bp, per_row, weight_bytes, budget)
    grid = (Bp // tile_b, T)

    vmem_need = weight_bytes + tile_b * per_row + (2 << 20)
    vmem_limit = int(min(max(vmem_need, 32 << 20), budget))

    # Pad ONCE for the whole sequence.
    xs_p = jnp.pad(xs.astype(jnp.float32), ((0, 0), (0, Bp - B), (0, Ip - I)))
    z0_p, v0_p, i0_p = pad_lif_mc_state(z0, v0, i0, g_t)

    kernel = functools.partial(
        _lif_mc_seq_kernel, n_in_rows=Ip,
        dt=float(dt), tau_syn_inv=float(tau_syn_inv),
        tau_mem_inv=float(tau_mem_inv), v_leak=float(v_leak),
        v_th=float(v_th), v_reset=float(v_reset), mxu_dtype=mxu_dtype)

    cost = pl.CostEstimate(
        flops=2 * T * Bp * Hp * (Ip + 2 * Hp), transcendentals=0,
        bytes_accessed=weight_bytes + T * Bp * (4 * Ip + 2 * Hp) + 20 * Bp * Hp)

    x_spec = pl.BlockSpec((1, tile_b, Ip), lambda b, t: (t, b, 0))
    st_spec = pl.BlockSpec((tile_b, Hp), lambda b, t: (b, 0))
    zs_spec = pl.BlockSpec((1, tile_b, Hp), lambda b, t: (t, b, 0))
    w_spec = pl.BlockSpec((Ip + Hp, Hp), lambda b, t: (0, 0),
                          pipeline_mode=pl.Buffered(1))
    g_spec = pl.BlockSpec((Hp, Hp), lambda b, t: (0, 0),
                          pipeline_mode=pl.Buffered(1))

    zs, z_T, v_T, i_T = pl.pallas_call(
        kernel,
        grid=grid,
        out_shape=(
            jax.ShapeDtypeStruct((T, Bp, Hp), jnp.bfloat16),   # spikes per step
            jax.ShapeDtypeStruct((Bp, Hp), jnp.bfloat16),      # final z
            jax.ShapeDtypeStruct((Bp, Hp), jnp.float32),       # final v
            jax.ShapeDtypeStruct((Bp, Hp), jnp.float32),       # final i
        ),
        in_specs=[x_spec, st_spec, st_spec, st_spec, w_spec, g_spec],
        out_specs=(zs_spec, st_spec, st_spec, st_spec),
        scratch_shapes=[pltpu.VMEM((tile_b, Hp), jnp.float32)] * 3,
        compiler_params=pltpu.CompilerParams(
            dimension_semantics=("parallel", "arbitrary"),
            vmem_limit_bytes=vmem_limit),
        cost_estimate=cost,
    )(xs_p, z0_p, v0_p, i0_p, w_cat, g_t)

    z_seq = zs[:, :B, :H].astype(jnp.float32)
    z_f, v_f, i_f = unpad_lif_mc_state(z_T, v_T, i_T, B, H)
    return z_seq, (z_f, v_f, i_f)


# --------------------------------------------------------------------------- #
# Pure-JAX reference (mirrors lif_mc_step exactly)
# --------------------------------------------------------------------------- #
def _reference(x, z, v, i, wi, wr, g, *, dt=0.001, tau_syn_inv=200.0,
               tau_mem_inv=100.0, v_leak=0.0, v_th=1.0, v_reset=0.0):
    v_c = v + dt * (v @ g.T)
    v_decayed = v_c + dt * tau_mem_inv * (v_leak - v_c + i)
    i_decayed = i - dt * tau_syn_inv * i
    z_new = jnp.where(v_decayed - v_th <= 0.0, 0.0, 1.0)
    v_new = (1.0 - z_new) * v_decayed + z_new * v_reset
    i_new = i_decayed + x @ wi.T + z @ wr.T
    return z_new, v_new, i_new, v_decayed


if __name__ == "__main__":
    B, INPUT, HIDDEN, T = 2, 16, 32, 6
    key = jax.random.PRNGKey(0)
    k_x, k_z, k_v, k_i, k_wi, k_wr, k_g, k_xs = jax.random.split(key, 8)

    # Input spikes (0/1), nontrivial state, and a small spike sequence.
    x = (jax.random.uniform(k_x, (B, INPUT)) > 0.5).astype(jnp.float32)
    z = (jax.random.uniform(k_z, (B, HIDDEN)) > 0.5).astype(jnp.float32)
    v = jax.random.normal(k_v, (B, HIDDEN), jnp.float32)
    i = jax.random.normal(k_i, (B, HIDDEN), jnp.float32)
    xs = (jax.random.uniform(k_xs, (T, B, INPUT)) > 0.7).astype(jnp.float32)

    # Deterministic parameter init mirroring torch.randn(...)/sqrt(fan_in).
    input_weights = jax.random.normal(k_wi, (HIDDEN, INPUT), jnp.float32) / jnp.sqrt(INPUT)
    recurrent_weights = jax.random.normal(k_wr, (HIDDEN, HIDDEN), jnp.float32) / jnp.sqrt(HIDDEN)
    g_coupling = jax.random.normal(k_g, (HIDDEN, HIDDEN), jnp.float32) / jnp.sqrt(HIDDEN)

    z_r, v_r, i_r, v_dec_r = _reference(x, z, v, i, input_weights,
                                        recurrent_weights, g_coupling)

    # ---- exactness check: f32 weights vs the pure-JAX reference ----
    w_cat32, g_t32 = prepare_lif_mc_weights(input_weights, recurrent_weights,
                                            g_coupling, dtype=jnp.float32)
    z_new, (z_s, v_s, i_s) = lif_mc_cell_forward(x, z, v, i, w_cat32, g_t32)
    jax.block_until_ready((z_new, v_s, i_s))
    assert jnp.allclose(z_new, z_r, atol=1e-5), "z mismatch (f32)"
    assert jnp.allclose(v_s, v_r, atol=1e-5), "v mismatch (f32)"
    assert jnp.allclose(i_s, i_r, atol=1e-5), "i mismatch (f32)"

    # ---- default (bf16-weight) path: looser tolerances; spikes checked only
    #      away from the threshold (explicit precision/throughput tradeoff) ----
    w_cat, g_t = prepare_lif_mc_weights(input_weights, recurrent_weights, g_coupling)
    z_b, (_, v_b, i_b) = lif_mc_cell_forward(x, z, v, i, w_cat, g_t)
    jax.block_until_ready((z_b, v_b, i_b))
    assert jnp.allclose(v_b, v_r, atol=1e-1), "v mismatch (bf16)"
    assert jnp.allclose(i_b, i_r, atol=1e-1), "i mismatch (bf16)"
    near_threshold = jnp.abs(v_dec_r - 1.0) <= 5e-2
    assert bool(jnp.all((z_b == z_r) | near_threshold)), "z mismatch (bf16)"

    # ---- sequence kernel (f32 weights): T fused steps, state resident in VMEM ----
    z_seq, (z_T, v_T, i_T) = lif_mc_cell_forward_sequence(xs, z, v, i, w_cat32, g_t32)
    jax.block_until_ready((z_seq, z_T, v_T, i_T))
    z_t, v_t, i_t = z, v, i
    for t in range(T):
        z_t, v_t, i_t, _ = _reference(xs[t], z_t, v_t, i_t, input_weights,
                                      recurrent_weights, g_coupling)
        assert jnp.allclose(z_seq[t], z_t, atol=1e-5), f"z_seq mismatch @t={t}"
    assert jnp.allclose(v_T, v_t, atol=1e-4), "final v mismatch (sequence)"
    assert jnp.allclose(i_T, i_t, atol=1e-4), "final i mismatch (sequence)"
    assert jnp.allclose(z_T, z_t, atol=1e-5), "final z mismatch (sequence)"

    print("KERNEL_OK")
</pallas_src>

<mosaic_0001>
module attributes {stable_mosaic.version = 11 : i64} {
  func.func @_lif_mc_step_kernel(%arg0: i32, %arg1: memref<8x128xf32, #tpu.memory_space<vmem>>, %arg2: memref<8x128xbf16, #tpu.memory_space<vmem>>, %arg3: memref<8x128xf32, #tpu.memory_space<vmem>>, %arg4: memref<8x128xf32, #tpu.memory_space<vmem>>, %arg5: memref<256x128xf32, #tpu.memory_space<vmem>>, %arg6: memref<128x128xf32, #tpu.memory_space<vmem>>, %arg7: memref<8x128xbf16, #tpu.memory_space<vmem>>, %arg8: memref<8x128xf32, #tpu.memory_space<vmem>>, %arg9: memref<8x128xf32, #tpu.memory_space<vmem>>) attributes {dimension_semantics = [#tpu.dimension_semantics<parallel>], iteration_bounds = array<i64: 1>, scalar_prefetch = 0 : i64, scratch_operands = 0 : i64, tpu.core_type = #tpu.core_type<tc>, window_params = [{transform_indices = @transform_0, window_bounds = array<i64: 8, 128>}, {transform_indices = @transform_1, window_bounds = array<i64: 8, 128>}, {transform_indices = @transform_2, window_bounds = array<i64: 8, 128>}, {transform_indices = @transform_3, window_bounds = array<i64: 8, 128>}, {pipeline_mode = #tpu.pipeline_mode<synchronous>, transform_indices = @transform_4, window_bounds = array<i64: 256, 128>}, {pipeline_mode = #tpu.pipeline_mode<synchronous>, transform_indices = @transform_5, window_bounds = array<i64: 128, 128>}, {transform_indices = @transform_6, window_bounds = array<i64: 8, 128>}, {transform_indices = @transform_7, window_bounds = array<i64: 8, 128>}, {transform_indices = @transform_8, window_bounds = array<i64: 8, 128>}]} {
    %c0 = arith.constant 0 : index
    %c0_0 = arith.constant 0 : index
    %0 = vector.load %arg3[%c0, %c0_0] : memref<8x128xf32, #tpu.memory_space<vmem>>, vector<8x128xf32>
    %c0_1 = arith.constant 0 : index
    %c0_2 = arith.constant 0 : index
    %1 = vector.load %arg4[%c0_1, %c0_2] : memref<8x128xf32, #tpu.memory_space<vmem>>, vector<8x128xf32>
    %c0_3 = arith.constant 0 : index
    %c0_4 = arith.constant 0 : index
    %2 = vector.load %arg6[%c0_3, %c0_4] : memref<128x128xf32, #tpu.memory_space<vmem>>, vector<128x128xf32>
    %cst = arith.constant dense<0.000000e+00> : vector<8x128xf32>
    %3 = tpu.matmul %0, %2, %cst {dimension_numbers = #tpu.dot_dimension_numbers<[1], [0], [0], [1], [0, 0, 1, 1], [], []>} : vector<8x128xf32>, vector<128x128xf32>, vector<8x128xf32> -> vector<8x128xf32>
    %cst_5 = arith.constant 1.000000e-03 : f32
    %4 = vector.broadcast %cst_5 : f32 to vector<8x128xf32>
    %5 = arith.mulf %4, %3 : vector<8x128xf32>
    %6 = arith.addf %0, %5 : vector<8x128xf32>
    %cst_6 = arith.constant 0.000000e+00 : f32
    %7 = vector.broadcast %cst_6 : f32 to vector<8x128xf32>
    %8 = arith.subf %7, %6 : vector<8x128xf32>
    %9 = arith.addf %8, %1 : vector<8x128xf32>
    %cst_7 = arith.constant 1.000000e-01 : f32
    %10 = vector.broadcast %cst_7 : f32 to vector<8x128xf32>
    %11 = arith.mulf %10, %9 : vector<8x128xf32>
    %12 = arith.addf %6, %11 : vector<8x128xf32>
    %cst_8 = arith.constant 2.000000e-01 : f32
    %13 = vector.broadcast %cst_8 : f32 to vector<8x128xf32>
    %14 = arith.mulf %13, %1 : vector<8x128xf32>
    %15 = arith.subf %1, %14 : vector<8x128xf32>
    %cst_9 = arith.constant 1.000000e+00 : f32
    %16 = vector.broadcast %cst_9 : f32 to vector<8x128xf32>
    %17 = arith.cmpf ogt, %12, %16 : vector<8x128xf32>
    %cst_10 = arith.constant 0.000000e+00 : f32
    %18 = vector.broadcast %cst_10 : f32 to vector<8x128xf32>
    %19 = arith.select %17, %18, %12 : vector<8x128xi1>, vector<8x128xf32>
    %c0_11 = arith.constant 0 : index
    %c0_12 = arith.constant 0 : index
    %20 = vector.load %arg1[%c0_11, %c0_12] : memref<8x128xf32, #tpu.memory_space<vmem>>, vector<8x128xf32>
    %c0_13 = arith.constant 0 : index
    %c0_14 = arith.constant 0 : index
    %21 = vector.load %arg5[%c0_13, %c0_14] : memref<256x128xf32, #tpu.memory_space<vmem>>, vector<128x128xf32>
    %cst_15 = arith.constant dense<0.000000e+00> : vector<8x128xf32>
    %22 = tpu.matmul %20, %21, %cst_15 {dimension_numbers = #tpu.dot_dimension_numbers<[1], [0], [0], [1], [0, 0, 1, 1], [], []>} : vector<8x128xf32>, vector<128x128xf32>, vector<8x128xf32> -> vector<8x128xf32>
    %23 = arith.addf %15, %22 : vector<8x128xf32>
    %c0_16 = arith.constant 0 : index
    %c0_17 = arith.constant 0 : index
    %24 = vector.load %arg2[%c0_16, %c0_17] : memref<8x128xbf16, #tpu.memory_space<vmem>>, vector<8x128xbf16>
    %25 = arith.extf %24 : vector<8x128xbf16> to vector<8x128xf32>
    %c128 = arith.constant 128 : index
    %c0_18 = arith.constant 0 : index
    %26 = vector.load %arg5[%c128, %c0_18] : memref<256x128xf32, #tpu.memory_space<vmem>>, vector<128x128xf32>
    %cst_19 = arith.constant dense<0.000000e+00> : vector<8x128xf32>
    %27 = tpu.matmul %25, %26, %cst_19 {dimension_numbers = #tpu.dot_dimension_numbers<[1], [0], [0], [1], [0, 0, 1, 1], [], []>} : vector<8x128xf32>, vector<128x128xf32>, vector<8x128xf32> -> vector<8x128xf32>
    %28 = arith.addf %23, %27 : vector<8x128xf32>
    %29 = arith.extui %17 : vector<8x128xi1> to vector<8x128xi32>
    %30 = arith.sitofp %29 : vector<8x128xi32> to vector<8x128xf32>
    %31 = arith.truncf %30 : vector<8x128xf32> to vector<8x128xbf16>
    %c0_20 = arith.constant 0 : index
    %c0_21 = arith.constant 0 : index
    %32 = vector.load %arg7[%c0_20, %c0_21] : memref<8x128xbf16, #tpu.memory_space<vmem>>, vector<8x128xbf16>
    tpu.vector_store %arg7[%c0_20, %c0_21], %31 {strides = array<i32>} : memref<8x128xbf16, #tpu.memory_space<vmem>>, vector<8x128xbf16>,
    %c0_22 = arith.constant 0 : index
    %c0_23 = arith.constant 0 : index
    %33 = vector.load %arg8[%c0_22, %c0_23] : memref<8x128xf32, #tpu.memory_space<vmem>>, vector<8x128xf32>
    tpu.vector_store %arg8[%c0_22, %c0_23], %19 {strides = array<i32>} : memref<8x128xf32, #tpu.memory_space<vmem>>, vector<8x128xf32>,
    %c0_24 = arith.constant 0 : index
    %c0_25 = arith.constant 0 : index
    %34 = vector.load %arg9[%c0_24, %c0_25] : memref<8x128xf32, #tpu.memory_space<vmem>>, vector<8x128xf32>
    tpu.vector_store %arg9[%c0_24, %c0_25], %28 {strides = array<i32>} : memref<8x128xf32, #tpu.memory_space<vmem>>, vector<8x128xf32>,
    return
  }
  func.func @transform_0(%arg0: i32) -> (i32, i32) {
    %c0_i32 = arith.constant 0 : i32
    %c0_i32_0 = arith.constant 0 : i32
    return %arg0, %c0_i32 : i32, i32
  }
  func.func @transform_1(%arg0: i32) -> (i32, i32) {
    %c0_i32 = arith.constant 0 : i32
    %c0_i32_0 = arith.constant 0 : i32
    return %arg0, %c0_i32 : i32, i32
  }
  func.func @transform_2(%arg0: i32) -> (i32, i32) {
    %c0_i32 = arith.constant 0 : i32
    %c0_i32_0 = arith.constant 0 : i32
    return %arg0, %c0_i32 : i32, i32
  }
  func.func @transform_3(%arg0: i32) -> (i32, i32) {
    %c0_i32 = arith.constant 0 : i32
    %c0_i32_0 = arith.constant 0 : i32
    return %arg0, %c0_i32 : i32, i32
  }
  func.func @transform_4(%arg0: i32) -> (i32, i32) {
    %c0_i32 = arith.constant 0 : i32
    %c0_i32_0 = arith.constant 0 : i32
    %c0_i32_1 = arith.constant 0 : i32
    return %c0_i32, %c0_i32_0 : i32, i32
  }
  func.func @transform_5(%arg0: i32) -> (i32, i32) {
    %c0_i32 = arith.constant 0 : i32
    %c0_i32_0 = arith.constant 0 : i32
    %c0_i32_1 = arith.constant 0 : i32
    return %c0_i32, %c0_i32_0 : i32, i32
  }
  func.func @transform_6(%arg0: i32) -> (i32, i32) {
    %c0_i32 = arith.constant 0 : i32
    %c0_i32_0 = arith.constant 0 : i32
    return %arg0, %c0_i32 : i32, i32
  }
  func.func @transform_7(%arg0: i32) -> (i32, i32) {
    %c0_i32 = arith.constant 0 : i32
    %c0_i32_0 = arith.constant 0 : i32
    return %arg0, %c0_i32 : i32, i32
  }
  func.func @transform_8(%arg0: i32) -> (i32, i32) {
    %c0_i32 = arith.constant 0 : i32
    %c0_i32_0 = arith.constant 0 : i32
    return %arg0, %c0_i32 : i32, i32
  }
}

</mosaic_0001>

<bundles_post_ra>
// kernel: tpu_custom_call.1
= control target key start
LH: loop header
LB: loop body
LE: loop exit
PB: predicated region body
PF: predicated region fallthrough
CT: control target
= control target key end

     0   :  { %14 = vsyncpa [#allocation3], 0  ;;  %s1047_s0 = inlined_call_operand.vmem [shape: f32[8,128], index: 0, kind: input, shape index: {}]   ;;  %s1048_s1 = inlined_call_operand.hbm [shape: bf16[8,128], index: 1, kind: input, shape index: {}, may-alias: {1,6}]   ;;  %s1049_s2 = inlined_call_operand.hbm [shape: f32[8,128], index: 2, kind: input, shape index: {}, may-alias: {2,7}]   ;;  %s1050_s3 = inlined_call_operand.hbm [shape: f32[8,128], index: 3, kind: input, shape index: {}, may-alias: {3,8}]   ;;  %s1051_s4 = inlined_call_operand.hbm [shape: f32[256,128], index: 4, kind: input, shape index: {}]   ;;  %s1052_s5 = inlined_call_operand.hbm [shape: f32[128,128], index: 5, kind: input, shape index: {}]   ;;  %s1053_s6 = inlined_call_operand.hbm [shape: bf16[8,128], index: 6, kind: output, shape index: {0}, may-alias: {1,6}]   ;;  %s1054_s7 = inlined_call_operand.hbm [shape: f32[8,128], index: 7, kind: output, shape index: {1}, may-alias: {2,7}]   ;;  %s1055_s8 = inlined_call_operand.hbm [shape: f32[8,128], index: 8, kind: output, shape index: {2}, may-alias: {3,8}]  }
   0x1   :  { %15 = vsyncpa [#allocation6], 0 }
   0x2   :  { %16 = vsyncpa [#allocation9], 0 }
   0x3   :  { %17 = vsyncpa [#allocation4], 0 }
   0x4   :  { %18 = vsyncpa [#allocation13], 0  ;;  %s846_s27 = smov [#allocation5]   ;;  %s847_s29 = smov [#allocation8]  }
   0x5   :  { %s37_s28 = sshll.u32 %s846_s27, 4  ;;  %s56_s30 = sshll.u32 %s847_s29, 4  ;;  %s38_s28 = int_to_ptr.vmem [resolvable:$true] %s37_s28  ;;  %s904_s30 = int_to_ptr.vmem [resolvable:$true] %s56_s30 }
   0x6   :  { %s660_s11 = scalar_lea.hbm %s1049_s2, 128 }
   0x7   :  { %p661_p0 = scmp.ne.s32.totalorder %s1049_s2, %s660_s11  ;;  %p664_p1 = scmp.lt.u32.totalorder %s660_s11, %s1049_s2 }
   0x9   :  { %p666_p2 = pnand %p664_p1, %p661_p0 }
   0xb   :  { %669 = shalt.err (!%p666_p2)
}
   0xc   :  { %s670_s16 = scalar_lea.vmem %s38_s28, 128  ;;  %p675_p4 = scmp.lt.s32.totalorder %s38_s28, %s38_s28 }
   0xd   :  { %p671_p3 = scmp.ne.s32.totalorder %s38_s28, %s670_s16  ;;  %p676_p5 = scmp.lt.s32.totalorder %s670_s16, %s670_s16 }
   0xf   :  { %p677_p6 = por %p676_p5, %p675_p4 }
  0x11   :  { %p678_p7 = pnand %p677_p6, %p671_p3 }
  0x13   :  { %681 = shalt.err (!%p678_p7)
}
  0x14   :  { %40 = dma.hbm_to_vmem [thread:$0]  %s1049_s2, 128, %s38_s28, [#allocation6]  }
  0x15   :  { %s682_s21 = scalar_lea.hbm %s1051_s4, 4096 }
  0x16   :  { %p683_p8 = scmp.ne.s32.totalorder %s1051_s4, %s682_s21  ;;  %p686_p9 = scmp.lt.u32.totalorder %s682_s21, %s1051_s4 }
  0x18   :  { %p688_p10 = pnand %p686_p9, %p683_p8 }
  0x1a   :  { %691 = shalt.err (!%p688_p10)
}
  0x1b   :  { %s692_s26 = scalar_lea.vmem %s904_s30, 4096  ;;  %p697_p12 = scmp.lt.s32.totalorder %s904_s30, %s904_s30 }
  0x1c   :  { %p693_p11 = scmp.ne.s32.totalorder %s904_s30, %s692_s26  ;;  %p698_p13 = scmp.lt.s32.totalorder %s692_s26, %s692_s26 }
  0x1e   :  { %p699_p0 = por %p698_p13, %p697_p12 }
  0x20   :  { %p700_p1 = pnand %p699_p0, %p693_p11 }
  0x22   :  { %703 = shalt.err (!%p700_p1)
}
  0x23   :  { %s848_s2 = smov 128   ;;  %s849_s27 = smov 8  }
  0x24   :  { %62 = dma.hbm_to_vmem [thread:$0]  %s1051_s4, 4096, %s904_s30, [#allocation9], %s848_s2, %s848_s2, %s849_s27  }
  0x25   :  { %s850_s9 = smov [#allocation2]   ;;  %s851_s11 = smov [#allocation7]  }
  0x26   :  { %s27_s10 = sshll.u32 %s850_s9, 4  ;;  %s47_s12 = sshll.u32 %s851_s11, 4  ;;  %s28_s10 = int_to_ptr.vmem [resolvable:$true] %s27_s10  ;;  %s48_s12 = int_to_ptr.vmem [resolvable:$true] %s47_s12 }
  0x27   :  { %s704_s15 = scalar_lea.hbm %s1048_s1, 64 }
  0x28   :  { %p705_p2 = scmp.ne.s32.totalorder %s1048_s1, %s704_s15  ;;  %p708_p3 = scmp.lt.u32.totalorder %s704_s15, %s1048_s1 }
  0x2a   :  { %p710_p4 = pnand %p708_p3, %p705_p2 }
  0x2c   :  { %713 = shalt.err (!%p710_p4)
}
  0x2d   :  { %s714_s4 = scalar_lea.vmem %s28_s10, 64  ;;  %p719_p6 = scmp.lt.s32.totalorder %s28_s10, %s28_s10 }
  0x2e   :  { %p715_p5 = scmp.ne.s32.totalorder %s28_s10, %s714_s4  ;;  %p720_p7 = scmp.lt.s32.totalorder %s714_s4, %s714_s4 }
  0x30   :  { %p721_p8 = por %p720_p7, %p719_p6 }
  0x32   :  { %p722_p9 = pnand %p721_p8, %p715_p5 }
  0x34   :  { %725 = shalt.err (!%p722_p9)
}
  0x35   :  { %30 = dma.hbm_to_vmem [thread:$0]  %s1048_s1, 64, %s28_s10, [#allocation3]  }
  0x36   :  { %s726_s23 = scalar_lea.hbm %s1050_s3, 128 }
  0x37   :  { %p727_p10 = scmp.ne.s32.totalorder %s1050_s3, %s726_s23  ;;  %p730_p11 = scmp.lt.u32.totalorder %s726_s23, %s1050_s3 }
  0x39   :  { %p732_p12 = pnand %p730_p11, %p727_p10 }
  0x3b   :  { %735 = shalt.err (!%p732_p12)
}
  0x3c   :  { %s736_s29 = scalar_lea.vmem %s48_s12, 128  ;;  %p741_p0 = scmp.lt.s32.totalorder %s48_s12, %s48_s12 }
  0x3d   :  { %p737_p13 = scmp.ne.s32.totalorder %s48_s12, %s736_s29  ;;  %p742_p1 = scmp.lt.s32.totalorder %s736_s29, %s736_s29 }
  0x3f   :  { %p743_p2 = por %p742_p1, %p741_p0 }
  0x41   :  { %p744_p3 = pnand %p743_p2, %p737_p13 }
  0x43   :  { %747 = shalt.err (!%p744_p3)
}
  0x44   :  { %50 = dma.hbm_to_vmem [thread:$0]  %s1050_s3, 128, %s48_s12, [#allocation6]  }
  0x45   :  { %s852_s10 = smov [#allocation10]   ;;  %s748_s15 = scalar_lea.hbm %s1052_s5, 2048 }
  0x46   :  { %s68_s11 = sshll.u32 %s852_s10, 4  ;;  %p749_p4 = scmp.ne.s32.totalorder %s1052_s5, %s748_s15  ;;  %s69_s11 = int_to_ptr.vmem [resolvable:$true] %s68_s11 }
  0x47   :  { %p752_p5 = scmp.lt.u32.totalorder %s748_s15, %s1052_s5 }
  0x49   :  { %p754_p6 = pnand %p752_p5, %p749_p4 }
  0x4b   :  { %757 = shalt.err (!%p754_p6)
}
  0x4c   :  { %s758_s4 = scalar_lea.vmem %s69_s11, 2048  ;;  %p763_p8 = scmp.lt.s32.totalorder %s69_s11, %s69_s11 }
  0x4d   :  { %p759_p7 = scmp.ne.s32.totalorder %s69_s11, %s758_s4  ;;  %p764_p9 = scmp.lt.s32.totalorder %s758_s4, %s758_s4 }
  0x4f   :  { %p765_p10 = por %p764_p9, %p763_p8 }
  0x51   :  { %p766_p11 = pnand %p765_p10, %p759_p7 }
  0x53   :  { %769 = shalt.err (!%p766_p11)
}
  0x54   :  { %74 = dma.hbm_to_vmem [thread:$0]  %s1052_s5, 2048, %s69_s11, [#allocation9], %s848_s2, %s848_s2, %s849_s27  }
  0x55   :  { %836 = dma.done.wait [#allocation3], 64  }
  0x56   :  { %837 = vsyncadd [#allocation3], 4294967232 }
  0x57   :  { %838 = dma.done.wait [#allocation6], 256  }
  0x58   :  { %839 = vsyncadd [#allocation6], 4294967040 }
  0x59   :  { %840 = dma.done.wait [#allocation9], 6144  }
  0x5a   :  { %841 = vsyncadd [#allocation9], 4294961152  ;;  %v853_v0 = vmov 0.0|0.0   ;;  %vm854_vm0 = vmmov 0   ;;  %v855_v1 = vmov 0.0   ;;  %v189_v2 = vld [vmem:[#allocation8] sm:$0xff] }
  0x5b   :  { %596 = vmatprep.subr.bf16.mxu1 %v853_v0  ;;  %572 = vmatprep.subr.bf16.mxu0 %v853_v0  ;;  %v190_v3 = vld [vmem:[#allocation8 + $0x8] sm:$0xff]  ;;  %v191_v4 = vld [vmem:[#allocation8 + $0x10] sm:$0xff]  ;;  %v192_v6 = vld [vmem:[#allocation8 + $0x18] sm:$0xff]  ;;  %s857_s30 = smov [#allocation11]  }
  0x5c   :  { %534 = vmatprep.mubr.msk.f32.mxu1 %vm854_vm0, %v855_v1  ;;  %499 = vmatprep.mubr.msk.f32.mxu0 %vm854_vm0, %v855_v1  ;;  %v597_v5 = vpack.c.bf16 %v190_v3, %v189_v2  ;;  %v92_v7 = vld [vmem:[#allocation10] sm:$0xff]  ;;  %v93_v8 = vld [vmem:[#allocation10 + $0x8] sm:$0xff]  ;;  %v600_v9 = vpack.c.bf16 %v192_v6, %v191_v4  ;;  %v94_v11 = vld [vmem:[#allocation10 + $0x10] sm:$0xff]  ;;  %s377_s20 = sshll.u32 %s857_s30, 4  ;;  %s378_s20 = int_to_ptr.vmem [resolvable:$true] %s377_s20 }
  0x5d   :  { %v573_v10 = vpack.c.bf16 %v93_v8, %v92_v7  ;;  %v95_v12 = vld [vmem:[#allocation10 + $0x18] sm:$0xff]  ;;  %v193_v13 = vld [vmem:[#allocation8 + $0x20] sm:$0xff]  ;;  %v194_v14 = vld [vmem:[#allocation8 + $0x28] sm:$0xff] }
  0x5e   :  { %598 = vmatpush3.bf16.msra.mxu1 %v597_v5  ;;  %v576_v15 = vpack.c.bf16 %v95_v12, %v94_v11  ;;  %v96_v16 = vld [vmem:[#allocation10 + $0x20] sm:$0xff]  ;;  %v97_v17 = vld [vmem:[#allocation10 + $0x28] sm:$0xff]  ;;  %v603_v18 = vpack.c.bf16 %v194_v14, %v193_v13  ;;  %v195_v19 = vld [vmem:[#allocation8 + $0x30] sm:$0xff] }
  0x5f   :  { %599 = vmatprep.subr.bf16.mxu1 %v853_v0  ;;  %574 = vmatpush3.bf16.msra.mxu0 %v573_v10  ;;  %v196_v20 = vld [vmem:[#allocation8 + $0x38] sm:$0xff]  ;;  %v579_v21 = vpack.c.bf16 %v97_v17, %v96_v16  ;;  %v98_v22 = vld [vmem:[#allocation10 + $0x30] sm:$0xff]  ;;  %v197_v25 = vld [vmem:[#allocation8 + $0x40] sm:$0xff] }
  0x60   :  { %575 = vmatprep.subr.bf16.mxu0 %v853_v0  ;;  %v99_v23 = vld [vmem:[#allocation10 + $0x38] sm:$0xff]  ;;  %v606_v24 = vpack.c.bf16 %v196_v20, %v195_v19  ;;  %v198_v26 = vld [vmem:[#allocation8 + $0x48] sm:$0xff]  ;;  %v100_v28 = vld [vmem:[#allocation10 + $0x40] sm:$0xff] }
  0x61   :  { %v582_v27 = vpack.c.bf16 %v99_v23, %v98_v22  ;;  %v101_v29 = vld [vmem:[#allocation10 + $0x48] sm:$0xff]  ;;  %v609_v30 = vpack.c.bf16 %v198_v26, %v197_v25  ;;  %v199_v31 = vld [vmem:[#allocation8 + $0x50] sm:$0xff]  ;;  %v200_v32 = vld [vmem:[#allocation8 + $0x58] sm:$0xff] }
  0x62   :  { %601 = vmatpush3.bf16.msra.mxu1 %v600_v9  ;;  %v585_v33 = vpack.c.bf16 %v101_v29, %v100_v28  ;;  %v102_v34 = vld [vmem:[#allocation10 + $0x50] sm:$0xff]  ;;  %v103_v35 = vld [vmem:[#allocation10 + $0x58] sm:$0xff]  ;;  %v612_v36 = vpack.c.bf16 %v200_v32, %v199_v31  ;;  %v201_v37 = vld [vmem:[#allocation8 + $0x60] sm:$0xff] }
  0x63   :  { %602 = vmatprep.subr.bf16.mxu1 %v853_v0  ;;  %577 = vmatpush3.bf16.msra.mxu0 %v576_v15  ;;  %v202_v38 = vld [vmem:[#allocation8 + $0x68] sm:$0xff]  ;;  %v588_v39 = vpack.c.bf16 %v103_v35, %v102_v34  ;;  %v104_v40 = vld [vmem:[#allocation10 + $0x60] sm:$0xff]  ;;  %v203_v43 = vld [vmem:[#allocation8 + $0x70] sm:$0xff] }
  0x64   :  { %578 = vmatprep.subr.bf16.mxu0 %v853_v0  ;;  %v105_v41 = vld [vmem:[#allocation10 + $0x68] sm:$0xff]  ;;  %v615_v42 = vpack.c.bf16 %v202_v38, %v201_v37  ;;  %v204_v44 = vld [vmem:[#allocation8 + $0x78] sm:$0xff]  ;;  %v106_v46 = vld [vmem:[#allocation10 + $0x70] sm:$0xff] }
  0x65   :  { %v591_v45 = vpack.c.bf16 %v105_v41, %v104_v40  ;;  %v107_v47 = vld [vmem:[#allocation10 + $0x78] sm:$0xff]  ;;  %v618_v48 = vpack.c.bf16 %v204_v44, %v203_v43  ;;  %v278_v49 = vld [vmem:[#allocation8 + $0x80] sm:$0xff]  ;;  %v279_v50 = vld [vmem:[#allocation8 + $0x88] sm:$0xff] }
  0x66   :  { %604 = vmatpush3.bf16.msra.mxu1 %v603_v18  ;;  %v594_v51 = vpack.c.bf16 %v107_v47, %v106_v46  ;;  %v188_v52 = vld [vmem:[%s1047_s0] sm:$0xff]  ;;  %v621_v53 = vpack.c.bf16 %v279_v50, %v278_v49  ;;  %v281_v55 = vld [vmem:[#allocation8 + $0x98] sm:$0xff]  ;;  %v282_v58 = vld [vmem:[#allocation8 + $0xa0] sm:$0xff]  ;;  %s856_s0 = smov [#allocation12]  }
  0x67   :  { %605 = vmatprep.subr.bf16.mxu1 %v853_v0  ;;  %580 = vmatpush3.bf16.msra.mxu0 %v579_v21  ;;  %v280_v54 = vld [vmem:[#allocation8 + $0x90] sm:$0xff]  ;;  %v283_v59 = vld [vmem:[#allocation8 + $0xa8] sm:$0xff]  ;;  %v285_v62 = vld [vmem:[#allocation8 + $0xb8] sm:$0xff]  ;;  %s387_s27 = sshll.u32 %s856_s0, 4  ;;  %s388_s27 = int_to_ptr.vmem [resolvable:$true] %s387_s27 }
  0x68   :  { %581 = vmatprep.subr.bf16.mxu0 %v853_v0  ;;  %v90_v56 = vld [vmem:[#allocation5] sm:$0xff]  ;;  %v624_v57 = vpack.c.bf16 %v281_v55, %v280_v54  ;;  %v627_v60 = vpack.c.bf16 %v283_v59, %v282_v58  ;;  %v286_v2 = vld [vmem:[#allocation8 + $0xc0] sm:$0xff]  ;;  %v287_v3 = vld [vmem:[#allocation8 + $0xc8] sm:$0xff]  ;;  %s770_s21 = scalar_lea.vmem %s388_s27, 128  ;;  %p775_p13 = scmp.lt.s32.totalorder %s388_s27, %s388_s27 }
  0x69   :  { %v284_v61 = vld [vmem:[#allocation8 + $0xb0] sm:$0xff]  ;;  %v633_v4 = vpack.c.bf16 %v287_v3, %v286_v2  ;;  %v289_v6 = vld [vmem:[#allocation8 + $0xd8] sm:$0xff]  ;;  %v290_v8 = vld [vmem:[#allocation8 + $0xe0] sm:$0xff]  ;;  %p771_p12 = scmp.ne.s32.totalorder %s388_s27, %s770_s21  ;;  %p776_p0 = scmp.lt.s32.totalorder %s770_s21, %s770_s21 }
  0x6a   :  { %607 = vmatpush3.bf16.msra.mxu1 %v606_v24  ;;  %v630_v63 = vpack.c.bf16 %v285_v62, %v284_v61  ;;  %v288_v5 = vld [vmem:[#allocation8 + $0xd0] sm:$0xff]  ;;  %v291_v9 = vld [vmem:[#allocation8 + $0xe8] sm:$0xff]  ;;  %v293_v12 = vld [vmem:[#allocation8 + $0xf8] sm:$0xff] }
  0x6b   :  { %608 = vmatprep.subr.bf16.mxu1 %v853_v0  ;;  %583 = vmatpush3.bf16.msra.mxu0 %v582_v27  ;;  %v636_v7 = vpack.c.bf16 %v289_v6, %v288_v5  ;;  %v639_v10 = vpack.c.bf16 %v291_v9, %v290_v8  ;;  %v292_v11 = vld [vmem:[#allocation8 + $0xf0] sm:$0xff]  ;;  %v276_v14 = vld [vmem:[#allocation2] sm:$0xf]  ;;  %v91_v20 = vld [vmem:[#allocation7] sm:$0xff]  ;;  %p777_p1 = por %p776_p0, %p775_p13 }
  0x6c   :  { %584 = vmatprep.subr.bf16.mxu0 %v853_v0  ;;  %v642_v13 = vpack.c.bf16 %v293_v12, %v292_v11  ;;  %v277_v15 = vunpack.c.l.bf16 %v276_v14 }
  0x6d   :  { %p778_p2 = pnand %p777_p1, %p771_p12 }
  0x6e   :  { %610 = vmatpush3.bf16.msra.mxu1 %v609_v30 }
  0x6f   :  { %611 = vmatprep.subr.bf16.mxu1 %v853_v0  ;;  %586 = vmatpush3.bf16.msra.mxu0 %v585_v33 }
  0x70   :  { %587 = vmatprep.subr.bf16.mxu0 %v853_v0 }
  0x72   :  { %613 = vmatpush3.bf16.msra.mxu1 %v612_v36 }
  0x73   :  { %614 = vmatprep.subr.bf16.mxu1 %v853_v0  ;;  %589 = vmatpush3.bf16.msra.mxu0 %v588_v39 }
  0x74   :  { %590 = vmatprep.subr.bf16.mxu0 %v853_v0 }
  0x76   :  { %616 = vmatpush3.bf16.msra.mxu1 %v615_v42 }
  0x77   :  { %617 = vmatprep.subr.bf16.mxu1 %v853_v0  ;;  %592 = vmatpush3.bf16.msra.mxu0 %v591_v45 }
  0x78   :  { %593 = vmatprep.subr.bf16.mxu0 %v853_v0 }
  0x7a   :  { %619 = vmatpush3.bf16.msra.mxu1 %v618_v48 }
  0x7b   :  { %620 = vmatprep.subr.bf16.mxu1 %v853_v0  ;;  %595 = vmatpush3.bf16.msra.mxu0 %v594_v51 }
  0x7d   :  { %535 = vmatmul.mubr.f32.vlgmr.msra.gmra.mrb[0].mxu1 %v188_v52 }
  0x7e   :  { %622 = vmatpush3.bf16.msra.mxu1 %v621_v53  ;;  %569 = vmatprep.mubr.msk.f32.mxu1 %vm854_vm0, %v855_v1 }
  0x7f   :  { %623 = vmatprep.subr.bf16.mxu1 %v853_v0  ;;  %500 = vmatmul.mubr.f32.vlgmr.msra.gmra.mrb[0].mxu0 %v90_v56 }
  0x82   :  { %625 = vmatpush3.bf16.msra.mxu1 %v624_v57 }
  0x83   :  { %626 = vmatprep.subr.bf16.mxu1 %v853_v0 }
  0x86   :  { %628 = vmatpush3.bf16.msra.mxu1 %v627_v60 }
  0x87   :  { %629 = vmatprep.subr.bf16.mxu1 %v853_v0 }
  0x8a   :  { %631 = vmatpush3.bf16.msra.mxu1 %v630_v63 }
  0x8b   :  { %632 = vmatprep.subr.bf16.mxu1 %v853_v0 }
  0x8e   :  { %634 = vmatpush3.bf16.msra.mxu1 %v633_v4 }
  0x8f   :  { %635 = vmatprep.subr.bf16.mxu1 %v853_v0 }
  0x92   :  { %637 = vmatpush3.bf16.msra.mxu1 %v636_v7 }
  0x93   :  { %638 = vmatprep.subr.bf16.mxu1 %v853_v0 }
  0x96   :  { %640 = vmatpush3.bf16.msra.mxu1 %v639_v10 }
  0x97   :  { %641 = vmatprep.subr.bf16.mxu1 %v853_v0 }
  0x9a   :  { %643 = vmatpush3.bf16.msra.mxu1 %v642_v13 }
  0x9d   :  { %570 = vmatmul.mubr.f32.vlgmr.msra.gmra.mrb[0].mxu1 %v277_v15 }
 0x152   :  { %v174_v16 = vpop.f32.mrb[0].mxu0 }
 0x153   :  { %v178_v17 = vmul.f32 0.001, %v174_v16  ;;  %v501_v18 = vpop.f32.mrb[1].mxu0 }
 0x155   :  { %v179_v19 = vadd.f32 %v178_v17, %v90_v56 }
 0x157   :  { %v180_v21 = vsub.f32 0.0, %v179_v19 }
 0x159   :  { %v181_v22 = vadd.f32 %v180_v21, %v91_v20 }
 0x15b   :  { %v182_v23 = vmul.f32 0.1, %v181_v22 }
 0x15d   :  { %v183_v24 = vadd.f32 %v182_v23, %v179_v19 }
 0x15f   :  { %vm186_vm1 = vcmp.gt.f32.partialorder %v183_v24, 1.0 }
 0x160   :  { %v187_v25 = vsel %vm186_vm1, 0.0, %v183_v24  ;;  %v415_v0 = vsel %vm186_vm1, 1.0, %v855_v1 }
 0x161   :  { %369 = vst [vmem:[#allocation12] sm:$0xff] %v187_v25  ;;  %v367_v26 = vpack.c.bf16 %v415_v0, %v415_v0 }
 0x162   :  { %781 = shalt.err (!%p778_p2)
}
 0x163   :  { %s782_s24 = scalar_lea.hbm %s1054_s7, 128 }
 0x164   :  { %p783_p3 = scmp.ne.s32.totalorder %s1054_s7, %s782_s24  ;;  %p786_p4 = scmp.lt.u32.totalorder %s782_s24, %s1054_s7 }
 0x166   :  { %p788_p5 = pnand %p786_p4, %p783_p3 }
 0x168   :  { %791 = shalt.err (!%p788_p5)
}
 0x169   :  { %390 = dma.vmem_to_hbm [thread:$0]  %s388_s27, 128, %s1054_s7, [#allocation13]   ;;  %368 = vst [vmem:[#allocation11] sm:$0xf] %v367_v26 }
 0x16a   :  { %s792_s10 = scalar_lea.vmem %s378_s20, 64  ;;  %p797_p7 = scmp.lt.s32.totalorder %s378_s20, %s378_s20 }
 0x16b   :  { %p793_p6 = scmp.ne.s32.totalorder %s378_s20, %s792_s10  ;;  %p798_p8 = scmp.lt.s32.totalorder %s792_s10, %s792_s10 }
 0x16d   :  { %p799_p9 = por %p798_p8, %p797_p7 }
 0x16f   :  { %p800_p10 = pnand %p799_p9, %p793_p6 }
 0x171   :  { %803 = shalt.err (!%p800_p10)
}
 0x172   :  { %s804_s14 = scalar_lea.hbm %s1053_s6, 64 }
 0x173   :  { %p805_p11 = scmp.ne.s32.totalorder %s1053_s6, %s804_s14  ;;  %p808_p12 = scmp.lt.u32.totalorder %s804_s14, %s1053_s6 }
 0x175   :  { %p810_p13 = pnand %p808_p12, %p805_p11 }
 0x177   :  { %813 = shalt.err (!%p810_p13)
}
 0x178   :  { %380 = dma.vmem_to_hbm [thread:$0]  %s378_s20, 64, %s1053_s6, [#allocation4]   ;;  %v184_v1 = vmul.f32 0.2, %v91_v20  ;;  %v360_v28 = vpop.f32.mrb[0].mxu1 }
 0x179   :  { %s858_s4 = smov [#allocation14]   ;;  %v571_v30 = vpop.f32.mrb[1].mxu1 }
 0x17a   :  { %v185_v27 = vsub.f32 %v91_v20, %v184_v1  ;;  %s397_s3 = sshll.u32 %s858_s4, 4  ;;  %s398_s3 = int_to_ptr.vmem [resolvable:$true] %s397_s3 }
 0x17b   :  { %s814_s12 = scalar_lea.vmem %s398_s3, 128  ;;  %p819_p1 = scmp.lt.s32.totalorder %s398_s3, %s398_s3 }
 0x17c   :  { %v644_v29 = vadd.f32 %v360_v28, %v185_v27  ;;  %p815_p0 = scmp.ne.s32.totalorder %s398_s3, %s814_s12  ;;  %p820_p2 = scmp.lt.s32.totalorder %s814_s12, %s814_s12 }
 0x17e   :  { %370 = vst [vmem:[#allocation14] sm:$0xff] %v644_v29  ;;  %p821_p3 = por %p820_p2, %p819_p1 }
 0x180   :  { %p822_p4 = pnand %p821_p3, %p815_p0 }
 0x182   :  { %825 = shalt.err (!%p822_p4)
}
 0x183   :  { %s826_s6 = scalar_lea.hbm %s1055_s8, 128 }
 0x184   :  { %p827_p5 = scmp.ne.s32.totalorder %s1055_s8, %s826_s6  ;;  %p830_p6 = scmp.lt.u32.totalorder %s826_s6, %s1055_s8 }
 0x186   :  { %p832_p7 = pnand %p830_p6, %p827_p5 }
 0x188   :  { %835 = shalt.err (!%p832_p7)
}
 0x189   :  { %400 = dma.vmem_to_hbm [thread:$0]  %s398_s3, 128, %s1055_s8, [#allocation13]  }
 0x18a   :  { %842 = dma.done.wait [#allocation4], 64  }
 0x18b   :  { %843 = vsyncadd [#allocation4], 4294967232 }
 0x18c   :  { %844 = dma.done.wait [#allocation13], 256  }
 0x18d   :  { %845 = vsyncadd [#allocation13], 4294967040 }
 0x18e   :  { %410 = vsyncpa [#allocation3], 1 }
 0x18f   :  { %411 = vsyncpa [#allocation6], 1 }
 0x190   :  { %412 = vsyncpa [#allocation9], 1 }
 0x191   :  { %413 = vsyncpa [#allocation4], 1 }
 0x192   :  { %414 = vsyncpa [#allocation13], 1 }

</bundles_post_ra>
